<compile_context>
chip_gen: v5e
topology: v5e:2x2
jax: 0.10.0
libtpu: 0.0.40
codegen_flags: <defaults>
</compile_context>

<pallas_src>
import functools
import math

import jax
import jax.numpy as jnp
from jax.experimental import pallas as pl
from jax.experimental.pallas import tpu as pltpu

LANES = 128
SUBLANES = 8
TILE = SUBLANES * LANES          # 1024: copy-free reshape granule
LN2 = math.log(2.0)


def _round_up(x, m):
    return ((x + m - 1) // m) * m


def _device_plan(in_bytes_per_elem):
    """Generation-tuned (max_block_rows, vmem_limit_bytes, max core splits)."""
    try:
        kind = jax.devices()[0].device_kind.lower()
    except Exception:  # pragma: no cover - defensive
        kind = ""
    if "v7" in kind:
        max_block_rows, vmem_cap, max_splits = 16384, 40 << 20, 2   # 2 TCs/chip
    elif "v6" in kind:
        max_block_rows, vmem_cap, max_splits = 16384, 64 << 20, 1
    elif "v5" in kind:
        max_block_rows, vmem_cap, max_splits = 8192, 24 << 20, 1
    else:
        max_block_rows, vmem_cap, max_splits = 4096, 32 << 20, 1
    # Keep double-buffered input blocks inside the VMEM limit for any dtype.
    budget = vmem_cap - (4 << 20)
    rows_budget = budget // (2 * LANES * in_bytes_per_elem)
    max_block_rows = max(SUBLANES,
                         min(max_block_rows, (rows_budget // SUBLANES) * SUBLANES))
    return max_block_rows, vmem_cap, max_splits


def _logcosh_sum_kernel(total_rows, block_rows, blocks_per_split, has_ragged,
                        yp_ref, yt_ref, out_ref, acc_ref):
    c = pl.program_id(0)           # core-split axis ("parallel")
    i = pl.program_id(1)           # reduction axis ("arbitrary")

    @pl.when(i == 0)
    def _():
        acc_ref[...] = jnp.zeros_like(acc_ref)

    diff = yt_ref[...].astype(jnp.float32) - yp_ref[...].astype(jnp.float32)
    ad = jnp.abs(diff)
    # Stable log(2*cosh(d)) = |d| + log1p(exp(-2|d|)); the per-element -log(2)
    # is hoisted into the wrapper.
    val = ad + jnp.log1p(jnp.exp(-2.0 * ad))

    if has_ragged:
        row0 = (c * blocks_per_split + i) * block_rows
        needs_mask = row0 + block_rows > total_rows

        @pl.when(needs_mask)
        def _():
            # Only the single partial edge block pays for the iota/compare/where.
            ridx = jax.lax.broadcasted_iota(jnp.int32, (block_rows, LANES), 0)
            masked = jnp.where((row0 + ridx) < total_rows, val, 0.0)
            acc_ref[...] += jnp.sum(masked, axis=0, keepdims=True)

        @pl.when(jnp.logical_not(needs_mask))
        def _():
            acc_ref[...] += jnp.sum(val, axis=0, keepdims=True)
    else:
        acc_ref[...] += jnp.sum(val, axis=0, keepdims=True)

    @pl.when(i == pl.num_programs(1) - 1)
    def _():
        # Per-lane partials; the cross-lane reduce happens once in the wrapper.
        out_ref[...] = acc_ref[...]


def stable_log_cosh_loss(y_pred, y_true):
    assert y_pred.shape == y_true.shape
    n_elems = 1
    for d in y_pred.shape:
        n_elems *= d

    yp = y_pred.reshape(-1)
    yt = y_true.reshape(-1)

    # Copy-free lane-dense prefix; the ragged tail is handled with plain jnp.
    prefix = (n_elems // TILE) * TILE

    tail_sum = jnp.float32(0.0)
    if prefix < n_elems:
        dt = yt[prefix:].astype(jnp.float32) - yp[prefix:].astype(jnp.float32)
        adt = jnp.abs(dt)
        tail_sum = jnp.sum(adt + jnp.log1p(jnp.exp(-2.0 * adt)))

    if prefix == 0:
        # Fewer than 1024 elements: not worth a kernel launch; pure jnp.
        return (tail_sum - jnp.float32(n_elems * LN2)) / jnp.float32(n_elems)

    rows = prefix // LANES                      # multiple of SUBLANES
    ypk = yp[:prefix].reshape(rows, LANES)
    ytk = yt[:prefix].reshape(rows, LANES)

    in_bytes = ypk.dtype.itemsize + ytk.dtype.itemsize
    max_block_rows, vmem_cap, max_splits = _device_plan(in_bytes)

    def plan(splits):
        nb0 = pl.cdiv(rows, max_block_rows)
        nblocks_total = _round_up(nb0, splits)
        block_rows = min(rows, _round_up(pl.cdiv(rows, nblocks_total), SUBLANES))
        return nblocks_total, block_rows

    splits = min(max_splits, max(1, rows // SUBLANES))
    nblocks_total, block_rows = plan(splits)
    if splits > 1 and (nblocks_total - 1) * block_rows >= rows:
        # Not enough rows for every grid step to map to a distinct block.
        splits = 1
        nblocks_total, block_rows = plan(1)
    blocks_per_split = nblocks_total // splits
    has_ragged = (nblocks_total * block_rows) != rows
    last_block = pl.cdiv(rows, block_rows) - 1

    def in_map(c, i):
        # Safety clamp; with the block plan above it never changes the index,
        # so no block is DMA'd twice.
        b = jnp.minimum(c * blocks_per_split + i, last_block)
        return (b, 0)

    partials = pl.pallas_call(
        functools.partial(_logcosh_sum_kernel, rows, block_rows,
                          blocks_per_split, has_ragged),
        out_shape=jax.ShapeDtypeStruct((splits, LANES), jnp.float32),
        grid_spec=pltpu.PrefetchScalarGridSpec(
            num_scalar_prefetch=0,
            grid=(splits, blocks_per_split),
            in_specs=[
                pl.BlockSpec((block_rows, LANES), in_map),
                pl.BlockSpec((block_rows, LANES), in_map),
            ],
            out_specs=pl.BlockSpec((1, LANES), lambda c, i: (c, 0)),
            scratch_shapes=[pltpu.VMEM((1, LANES), jnp.float32)],
        ),
        compiler_params=pltpu.CompilerParams(
            dimension_semantics=("parallel", "arbitrary"),
            vmem_limit_bytes=vmem_cap,
        ),
    )(ypk, ytk)

    total = jnp.sum(partials) + tail_sum
    return (total - jnp.float32(n_elems * LN2)) / jnp.float32(n_elems)


def _reference(y_pred, y_true):
    diff = y_true.astype(jnp.float32) - y_pred.astype(jnp.float32)
    ad = jnp.abs(diff)
    return jnp.mean(ad + jnp.log1p(jnp.exp(-2.0 * ad)) - jnp.log(2.0))


if __name__ == "__main__":
    key = jax.random.PRNGKey(0)
    k1, k2 = jax.random.split(key)

    # Small shape consistent with an image-regression style loss: NCHW.
    shape = (2, 4, 16, 16)
    y_pred = jax.random.normal(k1, shape, dtype=jnp.float32)
    y_true = jax.random.normal(k2, shape, dtype=jnp.float32)

    loss = jax.jit(stable_log_cosh_loss)(y_pred, y_true)
    loss = jax.block_until_ready(loss)

    ref = _reference(y_pred, y_true)
    assert jnp.allclose(loss, ref, atol=1e-5, rtol=1e-5), (loss, ref)

    print("KERNEL_OK")
</pallas_src>

<mosaic_0001>
module attributes {stable_mosaic.version = 11 : i64} {
  func.func @_logcosh_sum_kernel(%arg0: i32, %arg1: i32, %arg2: memref<16x128xf32, #tpu.memory_space<vmem>>, %arg3: memref<16x128xf32, #tpu.memory_space<vmem>>, %arg4: memref<1x128xf32, #tpu.memory_space<vmem>>, %arg5: memref<1x128xf32, #tpu.memory_space<vmem>>) attributes {dimension_semantics = [#tpu.dimension_semantics<parallel>, #tpu.dimension_semantics<arbitrary>], iteration_bounds = array<i64: 1, 1>, scalar_prefetch = 0 : i64, scratch_operands = 1 : i64, tpu.core_type = #tpu.core_type<tc>, window_params = [{transform_indices = @transform_0, window_bounds = array<i64: 16, 128>}, {transform_indices = @transform_1, window_bounds = array<i64: 16, 128>}, {transform_indices = @transform_2, window_bounds = array<i64: 1, 128>}]} {
    %c0_i32 = arith.constant 0 : i32
    %0 = arith.cmpi eq, %arg1, %c0_i32 : i32
    %1 = arith.extui %0 : i1 to i32
    %c0_i32_0 = arith.constant 0 : i32
    %2 = arith.cmpi ne, %1, %c0_i32_0 : i32
    scf.if %2 {
      %cst_11 = arith.constant 0.000000e+00 : f32
      %20 = vector.broadcast %cst_11 : f32 to vector<1x128xf32>
      %c0_12 = arith.constant 0 : index
      %c0_13 = arith.constant 0 : index
      %21 = vector.load %arg5[%c0_12, %c0_13] : memref<1x128xf32, #tpu.memory_space<vmem>>, vector<1x128xf32>
      tpu.vector_store %arg5[%c0_12, %c0_13], %20 {strides = array<i32>} : memref<1x128xf32, #tpu.memory_space<vmem>>, vector<1x128xf32>,
    } else {
    }
    %c0 = arith.constant 0 : index
    %c0_1 = arith.constant 0 : index
    %3 = vector.load %arg3[%c0, %c0_1] : memref<16x128xf32, #tpu.memory_space<vmem>>, vector<16x128xf32>
    %c0_2 = arith.constant 0 : index
    %c0_3 = arith.constant 0 : index
    %4 = vector.load %arg2[%c0_2, %c0_3] : memref<16x128xf32, #tpu.memory_space<vmem>>, vector<16x128xf32>
    %5 = arith.subf %3, %4 : vector<16x128xf32>
    %6 = math.absf %5 : vector<16x128xf32>
    %cst = arith.constant -2.000000e+00 : f32
    %7 = vector.broadcast %cst : f32 to vector<16x128xf32>
    %8 = arith.mulf %7, %6 : vector<16x128xf32>
    %9 = math.exp %8 : vector<16x128xf32>
    %10 = math.log1p %9 : vector<16x128xf32>
    %11 = arith.addf %6, %10 : vector<16x128xf32>
    %c0_4 = arith.constant 0 : index
    %c0_5 = arith.constant 0 : index
    %12 = vector.load %arg5[%c0_4, %c0_5] : memref<1x128xf32, #tpu.memory_space<vmem>>, vector<1x128xf32>
    %cst_6 = arith.constant dense<0.000000e+00> : vector<128xf32>
    %13 = vector.multi_reduction <add>, %11, %cst_6 [0] : vector<16x128xf32> to vector<128xf32>
    %14 = vector.shape_cast %13 : vector<128xf32> to vector<1x128xf32>
    %15 = arith.addf %12, %14 : vector<1x128xf32>
    %c0_7 = arith.constant 0 : index
    %c0_8 = arith.constant 0 : index
    %16 = vector.load %arg5[%c0_7, %c0_8] : memref<1x128xf32, #tpu.memory_space<vmem>>, vector<1x128xf32>
    tpu.vector_store %arg5[%c0_7, %c0_8], %15 {strides = array<i32>} : memref<1x128xf32, #tpu.memory_space<vmem>>, vector<1x128xf32>,
    %c0_i32_9 = arith.constant 0 : i32
    %17 = arith.cmpi eq, %arg1, %c0_i32_9 : i32
    %18 = arith.extui %17 : i1 to i32
    %c0_i32_10 = arith.constant 0 : i32
    %19 = arith.cmpi ne, %18, %c0_i32_10 : i32
    scf.if %19 {
      %c0_11 = arith.constant 0 : index
      %c0_12 = arith.constant 0 : index
      %20 = vector.load %arg5[%c0_11, %c0_12] : memref<1x128xf32, #tpu.memory_space<vmem>>, vector<1x128xf32>
      %c0_13 = arith.constant 0 : index
      %c0_14 = arith.constant 0 : index
      %21 = vector.load %arg4[%c0_13, %c0_14] : memref<1x128xf32, #tpu.memory_space<vmem>>, vector<1x128xf32>
      tpu.vector_store %arg4[%c0_13, %c0_14], %20 {strides = array<i32>} : memref<1x128xf32, #tpu.memory_space<vmem>>, vector<1x128xf32>,
    } else {
    }
    return
  }
  func.func @transform_0(%arg0: i32, %arg1: i32) -> (i32, i32) {
    %c1_i32 = arith.constant 1 : i32
    %0 = arith.muli %arg0, %c1_i32 : i32
    %1 = arith.addi %0, %arg1 : i32
    %c0_i32 = arith.constant 0 : i32
    %2 = arith.minsi %1, %c0_i32 : i32
    %c0_i32_0 = arith.constant 0 : i32
    %c0_i32_1 = arith.constant 0 : i32
    return %2, %c0_i32_0 : i32, i32
  }
  func.func @transform_1(%arg0: i32, %arg1: i32) -> (i32, i32) {
    %c1_i32 = arith.constant 1 : i32
    %0 = arith.muli %arg0, %c1_i32 : i32
    %1 = arith.addi %0, %arg1 : i32
    %c0_i32 = arith.constant 0 : i32
    %2 = arith.minsi %1, %c0_i32 : i32
    %c0_i32_0 = arith.constant 0 : i32
    %c0_i32_1 = arith.constant 0 : i32
    return %2, %c0_i32_0 : i32, i32
  }
  func.func @transform_2(%arg0: i32, %arg1: i32) -> (i32, i32) {
    %c0_i32 = arith.constant 0 : i32
    %c0_i32_0 = arith.constant 0 : i32
    return %arg0, %c0_i32 : i32, i32
  }
}

</mosaic_0001>

<bundles_post_ra>
// kernel: stable_log_cosh_loss.1
= control target key start
LH: loop header
LB: loop body
LE: loop exit
PB: predicated region body
PF: predicated region fallthrough
CT: control target
= control target key end

     0   :  { %v154_v0 = vmov 0.0   ;;  %s185_s0 = inlined_call_operand.vmem [shape: f32[16,128], index: 0, kind: input, shape index: {}]   ;;  %s186_s1 = inlined_call_operand.vmem [shape: f32[16,128], index: 1, kind: input, shape index: {}]   ;;  %s187_s2 = inlined_call_operand.vmem [shape: f32[1,128], index: 2, kind: output, shape index: {}]  }
   0x1   :  { %79 = vst [vmem:[#allocation2] sm:$0x1] %v154_v0  ;;  %v80_v1 = vld [vmem:[%s186_s1] sm:$0xff]  ;;  %v81_v2 = vld [vmem:[%s186_s1 + $0x8] sm:$0xff] }
   0x2   :  { %v82_v3 = vld [vmem:[%s185_s0] sm:$0xff]  ;;  %v83_v4 = vld [vmem:[%s185_s0 + $0x8] sm:$0xff] }
   0x3   :  { %v84_v5 = vsub.f32 %v80_v1, %v82_v3  ;;  %v85_v6 = vsub.f32 %v81_v2, %v83_v4 }
   0x5   :  { %v86_v7 = vand.u32 2147483647, %v84_v5  ;;  %v87_v8 = vand.u32 2147483647, %v85_v6 }
   0x7   :  { %v88_v9 = vmul.f32 -2.0, %v86_v7  ;;  %v89_v10 = vmul.f32 -2.0, %v87_v8 }
   0x8   :  { %v114_v39 = vld [vmem:[#allocation2] sm:$0x1] }
   0x9   :  { %v90_v11 = vmul.f32 1.442695, %v88_v9  ;;  %v92_v12 = vmul.f32 1.442695, %v89_v10 }
   0xb   :  { %146 = vpow2.f32 %v90_v11 }
   0xc   :  { %148 = vpow2.f32 %v92_v12 }
  0x11   :  { %v147_v13 = vpop.eup %146 }
  0x12   :  { %v149_v14 = vpop.eup %148  ;;  %v94_v15 = vadd.f32 1.0, %v147_v13  ;;  %v97_v16 = vmul.f32 -0.5, %v147_v13  ;;  %v100_v20 = vand.u32 2147483647, %v147_v13 }
  0x13   :  { %v103_v17 = vadd.f32 1.0, %v149_v14  ;;  %v106_v18 = vmul.f32 -0.5, %v149_v14  ;;  %v109_v22 = vand.u32 2147483647, %v149_v14 }
  0x14   :  { %150 = vlog2.f32 %v94_v15  ;;  %v98_v19 = vadd.f32 1.0, %v97_v16  ;;  %vm101_vm0 = vcmp.lt.f32.partialorder %v100_v20, 0.0004427343 }
  0x15   :  { %152 = vlog2.f32 %v103_v17  ;;  %v107_v21 = vadd.f32 1.0, %v106_v18  ;;  %vm110_vm1 = vcmp.lt.f32.partialorder %v109_v22, 0.0004427343 }
  0x16   :  { %v99_v23 = vmul.f32 %v147_v13, %v98_v19 }
  0x17   :  { %v108_v25 = vmul.f32 %v149_v14, %v107_v21 }
  0x1a   :  { %v151_v24 = vpop.eup %150 }
  0x1b   :  { %v153_v26 = vpop.eup %152  ;;  %v96_v27 = vmul.f32 0.6931472, %v151_v24 }
  0x1c   :  { %v105_v28 = vmul.f32 0.6931472, %v153_v26 }
  0x1d   :  { %v102_v29 = vsel %vm101_vm0, %v99_v23, %v96_v27 }
  0x1e   :  { %v111_v30 = vsel %vm110_vm1, %v108_v25, %v105_v28  ;;  %v112_v31 = vadd.f32 %v102_v29, %v86_v7 }
  0x1f   :  { %v113_v32 = vadd.f32 %v111_v30, %v87_v8 }
  0x21   :  { %v115_v33 = vadd.f32 %v113_v32, %v112_v31 }
  0x23   :  { %v116_v34 = vrot.slane %v115_v33, 4 }
  0x25   :  { %v117_v35 = vadd.f32 %v116_v34, %v115_v33 }
  0x27   :  { %v118_v36 = vrot.slane %v117_v35, 2 }
  0x29   :  { %v119_v37 = vadd.f32 %v118_v36, %v117_v35 }
  0x2b   :  { %v120_v38 = vrot.slane %v119_v37, 1 }
  0x2d   :  { %v121_v40 = vadd.f32 %v120_v38, %v119_v37 }
  0x2f   :  { %v122_v41 = vadd.f32 %v121_v40, %v114_v39 }
  0x31   :  { %123 = vst [vmem:[#allocation2] sm:$0x1] %v122_v41 }
  0x38   :  { %v127_v42 = vld [vmem:[#allocation2] sm:$0x1] }
  0x39   :  { %128 = vst [vmem:[%s187_s2] sm:$0x1] %v127_v42 }

</bundles_post_ra>
